<compile_context>
chip_gen: v7x
topology: tpu7x:2x2x1
jax: 0.10.0
libtpu: 0.0.40
codegen_flags: <defaults>
</compile_context>

<pallas_src>
import functools

import jax
import jax.numpy as jnp
from jax.experimental import pallas as pl
from jax.experimental.pallas import tpu as pltpu

NUM_LATENTS = 8
NUM_ACTIONS = 3
NUM_HIDDENS = 128   # multiple of 128 -> all in-kernel gate/head slices lane-aligned
NUM_GAUSSIANS = 5
BATCH = 4
SEQ_LEN = 8


# ---------------------------------------------------------------------------
# Kernel: one MDRNN-LSTM step per grid iteration, weights VMEM-resident,
# h/c carried in VMEM scratch across the (sequential, "arbitrary") time axis.
# ---------------------------------------------------------------------------
def _mdrnn_seq_kernel(a_ref, l_ref, h0_ref, c0_ref, w_ref, wia_ref, wil_ref,
                      b_ref, out_ref, h_sc, c_sc, *, num_gaussians, num_latents):
    H = h0_ref.shape[1]
    G = num_gaussians
    GL = G * num_latents
    H4 = 4 * H
    t = pl.program_id(0)

    # Load the initial hidden state into the carried scratch on the first step.
    @pl.when(t == 0)
    def _():
        h_sc[...] = h0_ref[...]
        c_sc[...] = c0_ref[...]

    h = h_sc[...]
    c = c_sc[...]

    # ---- LSTMCell gates: h @ W_hh (aligned K=128) + a @ W_ia + l @ W_il + b --
    gates = jnp.dot(h.astype(jnp.bfloat16), w_ref[:, :H4],
                    preferred_element_type=jnp.float32)
    gates = gates + jnp.dot(a_ref[0].astype(jnp.bfloat16), wia_ref[...],
                            preferred_element_type=jnp.float32)
    gates = gates + jnp.dot(l_ref[0].astype(jnp.bfloat16), wil_ref[...],
                            preferred_element_type=jnp.float32)
    gates = gates + b_ref[:, :H4]

    i_g = jax.nn.sigmoid(gates[:, 0 * H:1 * H])
    f_g = jax.nn.sigmoid(gates[:, 1 * H:2 * H])
    g_g = jnp.tanh(gates[:, 2 * H:3 * H])
    o_g = jax.nn.sigmoid(gates[:, 3 * H:4 * H])

    c_new = f_g * c + i_g * g_g
    h_new = o_g * jnp.tanh(c_new)
    h_sc[...] = h_new
    c_sc[...] = c_new

    # ---- fused mixture-density heads: ONE [H, 128] matmul --------------------
    # column layout: [mu(GL) | sigma(GL) | logit(G) | reward(1) | term(1) | pad]
    z = jnp.dot(h_new.astype(jnp.bfloat16), w_ref[:, H4:],
                preferred_element_type=jnp.float32) + b_ref[:, H4:]
    head_w = z.shape[-1]

    lane = jax.lax.broadcasted_iota(jnp.int32, z.shape, 1)
    sig_mask = (lane >= GL) & (lane < 2 * GL)
    lp_mask = (lane >= 2 * GL) & (lane < 2 * GL + G)
    tm_mask = lane == (2 * GL + G + 1)

    # log_softmax over the G mixture-logit lanes only; exp is applied only to
    # masked/shifted values so non-logit lanes can never overflow.
    lp_vals = jnp.where(lp_mask, z, -jnp.inf)
    m = jnp.max(lp_vals, axis=-1, keepdims=True)
    p = jnp.exp(jnp.where(lp_mask, z - m, -jnp.inf))
    lse = jnp.log(jnp.sum(p, axis=-1, keepdims=True)) + m

    sig_vals = jnp.exp(jnp.where(sig_mask, z, 0.0))          # sigma lanes only
    tm_vals = jax.nn.sigmoid(jnp.where(tm_mask, z, 0.0))     # termination lane

    heads = z                                                 # mu / reward: identity
    heads = jnp.where(sig_mask, sig_vals, heads)              # sigma: exp
    heads = jnp.where(lp_mask, z - lse, heads)                # mixture: log_softmax
    heads = jnp.where(tm_mask, tm_vals, heads)                # termination: sigmoid

    # ---- single lane-dense packed output slab: [heads | h' | c'] -------------
    # Three 128-lane-aligned unmasked stores into ONE output ref (one DMA).
    out_ref[0, :, 0:head_w] = heads
    out_ref[0, :, head_w:head_w + H] = h_new
    out_ref[0, :, head_w + H:head_w + 2 * H] = c_new


# ---------------------------------------------------------------------------
# Parameters (PyTorch-style uniform init), pre-fused / pre-transposed.
# ---------------------------------------------------------------------------
def init_params(key, num_latents, num_actions, num_hiddens, num_gaussians):
    def uniform(k, shape, fan_in):
        bound = 1.0 / float(fan_in) ** 0.5
        return jax.random.uniform(k, shape, jnp.float32, -bound, bound)

    ks = jax.random.split(key, 14)
    A, L, H, G = num_actions, num_latents, num_hiddens, num_gaussians
    GL = G * L

    # LSTMCell weights (gate order i, f, g, o), stored as [in, 4H].
    w_ih = uniform(ks[0], (A + L, 4 * H), H)     # rows 0:A actions, A:A+L latents
    w_hh = uniform(ks[1], (H, 4 * H), H)
    b_ih = uniform(ks[2], (1, 4 * H), H)
    b_hh = uniform(ks[3], (1, 4 * H), H)

    head_dim = 2 * GL + G + 2
    head_pad = ((head_dim + 127) // 128) * 128   # lane-dense head width (=128)
    mu_w = uniform(ks[4], (H, GL), H)
    sg_w = uniform(ks[5], (H, GL), H)
    lp_w = uniform(ks[6], (H, G), H)
    rw_w = uniform(ks[7], (H, 1), H)
    tm_w = uniform(ks[8], (H, 1), H)
    mu_b = uniform(ks[9], (1, GL), H)
    sg_b = uniform(ks[10], (1, GL), H)
    lp_b = uniform(ks[11], (1, G), H)
    rw_b = uniform(ks[12], (1, 1), H)
    tm_b = uniform(ks[13], (1, 1), H)

    w_heads = jnp.concatenate(
        [mu_w, sg_w, lp_w, rw_w, tm_w,
         jnp.zeros((H, head_pad - head_dim), jnp.float32)], axis=1)
    b_heads = jnp.concatenate(
        [mu_b, sg_b, lp_b, rw_b, tm_b,
         jnp.zeros((1, head_pad - head_dim), jnp.float32)], axis=1)

    # Fused parameter buffers (built once at init time, NOT per call):
    w_main = jnp.concatenate([w_hh, w_heads], axis=1).astype(jnp.bfloat16)  # [H, 4H+128]
    w_ia = w_ih[:A].astype(jnp.bfloat16)                                    # [A, 4H]
    w_il = w_ih[A:].astype(jnp.bfloat16)                                    # [L, 4H]
    bias = jnp.concatenate([b_ih + b_hh, b_heads], axis=1)                  # f32 [1, 4H+128]
    return (w_main, w_ia, w_il, bias)


# ---------------------------------------------------------------------------
# pallas_call wrapper (sequence of T steps; the cell forward is T == 1).
# ---------------------------------------------------------------------------
def _pallas_sequence_call(params, a_seq, l_seq, h0, c0, num_gaussians, num_latents):
    w_main, w_ia, w_il, bias = params
    T, B, A = a_seq.shape
    L = l_seq.shape[-1]
    H = h0.shape[-1]
    w_total = w_main.shape[1]            # 4H + head_pad
    out_width = (w_total - 4 * H) + 2 * H

    kernel = functools.partial(_mdrnn_seq_kernel,
                               num_gaussians=num_gaussians,
                               num_latents=num_latents)
    return pl.pallas_call(
        kernel,
        grid=(T,),
        in_specs=[
            pl.BlockSpec((1, B, A), lambda t: (t, 0, 0)),       # actions[t]
            pl.BlockSpec((1, B, L), lambda t: (t, 0, 0)),       # latents[t]
            pl.BlockSpec((B, H), lambda t: (0, 0)),             # h0 (loaded once)
            pl.BlockSpec((B, H), lambda t: (0, 0)),             # c0 (loaded once)
            pl.BlockSpec((H, w_total), lambda t: (0, 0)),       # [W_hh | W_heads], resident
            pl.BlockSpec((A, 4 * H), lambda t: (0, 0)),         # W_ia, resident
            pl.BlockSpec((L, 4 * H), lambda t: (0, 0)),         # W_il, resident
            pl.BlockSpec((1, w_total), lambda t: (0, 0)),       # fused biases, resident
        ],
        out_specs=pl.BlockSpec((1, B, out_width), lambda t: (t, 0, 0)),
        out_shape=jax.ShapeDtypeStruct((T, B, out_width), jnp.float32),
        scratch_shapes=[pltpu.VMEM((B, H), jnp.float32),        # h carry
                        pltpu.VMEM((B, H), jnp.float32)],       # c carry
        compiler_params=pltpu.CompilerParams(
            dimension_semantics=("arbitrary",)),                # sequential time axis
    )(a_seq, l_seq, h0, c0, w_main, w_ia, w_il, bias)


def _unpack_heads(heads, num_gaussians, num_latents):
    G, L = num_gaussians, num_latents
    GL = G * L
    lead = heads.shape[:-1]
    mus = heads[..., :GL].reshape(lead + (G, L))
    sigmas = heads[..., GL:2 * GL].reshape(lead + (G, L))
    logpi = heads[..., 2 * GL:2 * GL + G]
    rewards = heads[..., 2 * GL + G:2 * GL + G + 1]
    terms = heads[..., 2 * GL + G + 1:2 * GL + G + 2]
    return mus, sigmas, logpi, rewards, terms


def _forward_seq_impl(params, a_seq, l_seq, h0, c0, num_gaussians, num_latents):
    packed = _pallas_sequence_call(params, a_seq, l_seq, h0, c0,
                                   num_gaussians, num_latents)
    H = h0.shape[-1]
    head_pad = packed.shape[-1] - 2 * H
    heads = packed[..., :head_pad]
    hs = packed[..., head_pad:head_pad + H]
    cs = packed[..., head_pad + H:]
    mus, sigmas, logpi, rewards, terms = _unpack_heads(heads, num_gaussians, num_latents)
    return mus, sigmas, logpi, rewards, terms, (hs, cs)


@functools.partial(jax.jit, static_argnames=("num_gaussians", "num_latents"))
def mdrnn_cell_forward(params, in_actions, in_hidden, in_latents,
                       *, num_gaussians, num_latents):
    """Single-step forward, matching MixtureDensityLSTMCell.forward."""
    h, c = in_hidden
    mus, sigmas, logpi, rewards, terms, (hs, cs) = _forward_seq_impl(
        params, in_actions[None], in_latents[None], h, c,
        num_gaussians, num_latents)
    return mus[0], sigmas[0], logpi[0], rewards[0], terms[0], (hs[0], cs[0])


@functools.partial(jax.jit, static_argnames=("num_gaussians", "num_latents"))
def mdrnn_sequence_forward(params, actions_seq, latents_seq, in_hidden,
                           *, num_gaussians, num_latents):
    """Amortized variant: T cell steps in one pallas_call (weights resident)."""
    h0, c0 = in_hidden
    return _forward_seq_impl(params, actions_seq, latents_seq, h0, c0,
                             num_gaussians, num_latents)


# ---------------------------------------------------------------------------
# Pure-JAX reference mirroring the PyTorch module (same fused bf16 params).
# ---------------------------------------------------------------------------
def _reference_step(params, a, l, h, c):
    w_main, w_ia, w_il, bias = params
    H = h.shape[-1]
    H4 = 4 * H
    gates = (jnp.dot(h.astype(jnp.bfloat16), w_main[:, :H4],
                     preferred_element_type=jnp.float32)
             + jnp.dot(a.astype(jnp.bfloat16), w_ia,
                       preferred_element_type=jnp.float32)
             + jnp.dot(l.astype(jnp.bfloat16), w_il,
                       preferred_element_type=jnp.float32)
             + bias[:, :H4])
    i = jax.nn.sigmoid(gates[:, 0 * H:1 * H])
    f = jax.nn.sigmoid(gates[:, 1 * H:2 * H])
    g = jnp.tanh(gates[:, 2 * H:3 * H])
    o = jax.nn.sigmoid(gates[:, 3 * H:4 * H])
    c_new = f * c + i * g
    h_new = o * jnp.tanh(c_new)
    z = jnp.dot(h_new.astype(jnp.bfloat16), w_main[:, H4:],
                preferred_element_type=jnp.float32) + bias[:, H4:]
    return z, h_new, c_new


def _ref_heads(z, num_gaussians, num_latents):
    G, L = num_gaussians, num_latents
    GL = G * L
    lead = z.shape[:-1]
    mus = z[..., :GL].reshape(lead + (G, L))
    sigmas = jnp.exp(z[..., GL:2 * GL]).reshape(lead + (G, L))
    logpi = jax.nn.log_softmax(z[..., 2 * GL:2 * GL + G], axis=-1)
    rewards = z[..., 2 * GL + G:2 * GL + G + 1]
    terms = jax.nn.sigmoid(z[..., 2 * GL + G + 1:2 * GL + G + 2])
    return mus, sigmas, logpi, rewards, terms


def _reference_cell(params, in_actions, in_hidden, in_latents,
                    num_gaussians, num_latents):
    h, c = in_hidden
    z, h_new, c_new = _reference_step(params, in_actions, in_latents, h, c)
    return _ref_heads(z, num_gaussians, num_latents) + ((h_new, c_new),)


def _reference_sequence(params, a_seq, l_seq, in_hidden, num_gaussians, num_latents):
    h, c = in_hidden
    zs, hs, cs = [], [], []
    for t in range(a_seq.shape[0]):
        z, h, c = _reference_step(params, a_seq[t], l_seq[t], h, c)
        zs.append(z); hs.append(h); cs.append(c)
    z = jnp.stack(zs)
    return _ref_heads(z, num_gaussians, num_latents) + ((jnp.stack(hs), jnp.stack(cs)),)


def _check_close(got, want, atol=2e-3, rtol=2e-3):
    flat_g = jax.tree_util.tree_leaves(got)
    flat_w = jax.tree_util.tree_leaves(want)
    assert len(flat_g) == len(flat_w)
    for a, b in zip(flat_g, flat_w):
        assert a.shape == b.shape, (a.shape, b.shape)
        assert jnp.allclose(a, b, atol=atol, rtol=rtol), \
            f"mismatch vs reference (max abs diff {jnp.max(jnp.abs(a - b))})"


if __name__ == "__main__":
    key = jax.random.PRNGKey(0)
    kp, ka, kl, kh, kc, kas, kls = jax.random.split(key, 7)

    params = init_params(kp, NUM_LATENTS, NUM_ACTIONS, NUM_HIDDENS, NUM_GAUSSIANS)

    in_actions = jax.random.normal(ka, (BATCH, NUM_ACTIONS), jnp.float32)
    in_latents = jax.random.normal(kl, (BATCH, NUM_LATENTS), jnp.float32)
    h0 = jax.random.normal(kh, (BATCH, NUM_HIDDENS), jnp.float32)
    c0 = jax.random.normal(kc, (BATCH, NUM_HIDDENS), jnp.float32)

    # --- single-step cell forward (the PyTorch module's forward) -------------
    outs = mdrnn_cell_forward(params, in_actions, (h0, c0), in_latents,
                              num_gaussians=NUM_GAUSSIANS, num_latents=NUM_LATENTS)
    outs = jax.block_until_ready(outs)
    ref = _reference_cell(params, in_actions, (h0, c0), in_latents,
                          NUM_GAUSSIANS, NUM_LATENTS)
    _check_close(outs, ref)

    # --- amortized sequence path: T steps inside one kernel ------------------
    a_seq = jax.random.normal(kas, (SEQ_LEN, BATCH, NUM_ACTIONS), jnp.float32)
    l_seq = jax.random.normal(kls, (SEQ_LEN, BATCH, NUM_LATENTS), jnp.float32)
    seq_outs = mdrnn_sequence_forward(params, a_seq, l_seq, (h0, c0),
                                      num_gaussians=NUM_GAUSSIANS,
                                      num_latents=NUM_LATENTS)
    seq_outs = jax.block_until_ready(seq_outs)
    seq_ref = _reference_sequence(params, a_seq, l_seq, (h0, c0),
                                  NUM_GAUSSIANS, NUM_LATENTS)
    _check_close(seq_outs, seq_ref)

    print("KERNEL_OK")
</pallas_src>

<mosaic_0001>
module attributes {stable_mosaic.version = 11 : i64} {
  func.func @_mdrnn_seq_kernel(%arg0: i32, %arg1: memref<1x4x3xf32, #tpu.memory_space<vmem>>, %arg2: memref<1x4x8xf32, #tpu.memory_space<vmem>>, %arg3: memref<4x128xf32, #tpu.memory_space<vmem>>, %arg4: memref<4x128xf32, #tpu.memory_space<vmem>>, %arg5: memref<128x640xbf16, #tpu.memory_space<vmem>>, %arg6: memref<3x512xbf16, #tpu.memory_space<vmem>>, %arg7: memref<8x512xbf16, #tpu.memory_space<vmem>>, %arg8: memref<1x640xf32, #tpu.memory_space<vmem>>, %arg9: memref<1x4x384xf32, #tpu.memory_space<vmem>>, %arg10: memref<4x128xf32, #tpu.memory_space<vmem>>, %arg11: memref<4x128xf32, #tpu.memory_space<vmem>>) attributes {dimension_semantics = [#tpu.dimension_semantics<arbitrary>], iteration_bounds = array<i64: 1>, scalar_prefetch = 0 : i64, scratch_operands = 2 : i64, tpu.core_type = #tpu.core_type<tc>, window_params = [{transform_indices = @transform_0, window_bounds = array<i64: 1, 4, 3>}, {transform_indices = @transform_1, window_bounds = array<i64: 1, 4, 8>}, {pipeline_mode = #tpu.pipeline_mode<synchronous>, transform_indices = @transform_2, window_bounds = array<i64: 4, 128>}, {pipeline_mode = #tpu.pipeline_mode<synchronous>, transform_indices = @transform_3, window_bounds = array<i64: 4, 128>}, {pipeline_mode = #tpu.pipeline_mode<synchronous>, transform_indices = @transform_4, window_bounds = array<i64: 128, 640>}, {pipeline_mode = #tpu.pipeline_mode<synchronous>, transform_indices = @transform_5, window_bounds = array<i64: 3, 512>}, {pipeline_mode = #tpu.pipeline_mode<synchronous>, transform_indices = @transform_6, window_bounds = array<i64: 8, 512>}, {pipeline_mode = #tpu.pipeline_mode<synchronous>, transform_indices = @transform_7, window_bounds = array<i64: 1, 640>}, {transform_indices = @transform_8, window_bounds = array<i64: 1, 4, 384>}]} {
    %c0_i32 = arith.constant 0 : i32
    %0 = arith.cmpi eq, %arg0, %c0_i32 : i32
    %1 = arith.extui %0 : i1 to i32
    %c0_i32_0 = arith.constant 0 : i32
    %2 = arith.cmpi ne, %1, %c0_i32_0 : i32
    scf.if %2 {
      %c0_46 = arith.constant 0 : index
      %c0_47 = arith.constant 0 : index
      %106 = vector.load %arg3[%c0_46, %c0_47] : memref<4x128xf32, #tpu.memory_space<vmem>>, vector<4x128xf32>
      %c0_48 = arith.constant 0 : index
      %c0_49 = arith.constant 0 : index
      %107 = vector.load %arg10[%c0_48, %c0_49] : memref<4x128xf32, #tpu.memory_space<vmem>>, vector<4x128xf32>
      tpu.vector_store %arg10[%c0_48, %c0_49], %106 {strides = array<i32>} : memref<4x128xf32, #tpu.memory_space<vmem>>, vector<4x128xf32>,
      %c0_50 = arith.constant 0 : index
      %c0_51 = arith.constant 0 : index
      %108 = vector.load %arg4[%c0_50, %c0_51] : memref<4x128xf32, #tpu.memory_space<vmem>>, vector<4x128xf32>
      %c0_52 = arith.constant 0 : index
      %c0_53 = arith.constant 0 : index
      %109 = vector.load %arg11[%c0_52, %c0_53] : memref<4x128xf32, #tpu.memory_space<vmem>>, vector<4x128xf32>
      tpu.vector_store %arg11[%c0_52, %c0_53], %108 {strides = array<i32>} : memref<4x128xf32, #tpu.memory_space<vmem>>, vector<4x128xf32>,
    } else {
    }
    %c0 = arith.constant 0 : index
    %c0_1 = arith.constant 0 : index
    %3 = vector.load %arg10[%c0, %c0_1] : memref<4x128xf32, #tpu.memory_space<vmem>>, vector<4x128xf32>
    %c0_2 = arith.constant 0 : index
    %c0_3 = arith.constant 0 : index
    %4 = vector.load %arg11[%c0_2, %c0_3] : memref<4x128xf32, #tpu.memory_space<vmem>>, vector<4x128xf32>
    %5 = arith.truncf %3 : vector<4x128xf32> to vector<4x128xbf16>
    %c0_4 = arith.constant 0 : index
    %c0_5 = arith.constant 0 : index
    %6 = vector.load %arg5[%c0_4, %c0_5] : memref<128x640xbf16, #tpu.memory_space<vmem>>, vector<128x512xbf16>
    %cst = arith.constant dense<0.000000e+00> : vector<4x512xf32>
    %7 = tpu.matmul %5, %6, %cst {dimension_numbers = #tpu.dot_dimension_numbers<[1], [0], [0], [1], [0, 0, 1, 1], [], []>} : vector<4x128xbf16>, vector<128x512xbf16>, vector<4x512xf32> -> vector<4x512xf32>
    %c0_6 = arith.constant 0 : index
    %c0_7 = arith.constant 0 : index
    %c0_8 = arith.constant 0 : index
    %8 = vector.load %arg1[%c0_6, %c0_7, %c0_8] : memref<1x4x3xf32, #tpu.memory_space<vmem>>, vector<1x4x3xf32>
    %9 = vector.shape_cast %8 : vector<1x4x3xf32> to vector<4x3xf32>
    %10 = arith.truncf %9 : vector<4x3xf32> to vector<4x3xbf16>
    %c0_9 = arith.constant 0 : index
    %c0_10 = arith.constant 0 : index
    %11 = vector.load %arg6[%c0_9, %c0_10] : memref<3x512xbf16, #tpu.memory_space<vmem>>, vector<3x512xbf16>
    %cst_11 = arith.constant dense<0.000000e+00> : vector<4x512xf32>
    %12 = tpu.matmul %10, %11, %cst_11 {dimension_numbers = #tpu.dot_dimension_numbers<[1], [0], [0], [1], [0, 0, 1, 1], [], []>} : vector<4x3xbf16>, vector<3x512xbf16>, vector<4x512xf32> -> vector<4x512xf32>
    %13 = arith.addf %7, %12 : vector<4x512xf32>
    %c0_12 = arith.constant 0 : index
    %c0_13 = arith.constant 0 : index
    %c0_14 = arith.constant 0 : index
    %14 = vector.load %arg2[%c0_12, %c0_13, %c0_14] : memref<1x4x8xf32, #tpu.memory_space<vmem>>, vector<1x4x8xf32>
    %15 = vector.shape_cast %14 : vector<1x4x8xf32> to vector<4x8xf32>
    %16 = arith.truncf %15 : vector<4x8xf32> to vector<4x8xbf16>
    %c0_15 = arith.constant 0 : index
    %c0_16 = arith.constant 0 : index
    %17 = vector.load %arg7[%c0_15, %c0_16] : memref<8x512xbf16, #tpu.memory_space<vmem>>, vector<8x512xbf16>
    %cst_17 = arith.constant dense<0.000000e+00> : vector<4x512xf32>
    %18 = tpu.matmul %16, %17, %cst_17 {dimension_numbers = #tpu.dot_dimension_numbers<[1], [0], [0], [1], [0, 0, 1, 1], [], []>} : vector<4x8xbf16>, vector<8x512xbf16>, vector<4x512xf32> -> vector<4x512xf32>
    %19 = arith.addf %13, %18 : vector<4x512xf32>
    %c0_18 = arith.constant 0 : index
    %c0_19 = arith.constant 0 : index
    %20 = vector.load %arg8[%c0_18, %c0_19] : memref<1x640xf32, #tpu.memory_space<vmem>>, vector<1x512xf32>
    %21 = vector.broadcast %20 : vector<1x512xf32> to vector<4x512xf32>
    %22 = arith.addf %19, %21 : vector<4x512xf32>
    %23 = vector.extract_strided_slice %22 {offsets = [0, 0], sizes = [4, 128], strides = [1, 1]} : vector<4x512xf32> to vector<4x128xf32>
    %24 = arith.negf %23 : vector<4x128xf32>
    %25 = math.exp %24 : vector<4x128xf32>
    %cst_20 = arith.constant 1.000000e+00 : f32
    %26 = vector.broadcast %cst_20 : f32 to vector<4x128xf32>
    %27 = arith.addf %26, %25 : vector<4x128xf32>
    %28 = arith.divf %26, %27 : vector<4x128xf32>
    %29 = vector.extract_strided_slice %22 {offsets = [0, 128], sizes = [4, 128], strides = [1, 1]} : vector<4x512xf32> to vector<4x128xf32>
    %30 = arith.negf %29 : vector<4x128xf32>
    %31 = math.exp %30 : vector<4x128xf32>
    %cst_21 = arith.constant 1.000000e+00 : f32
    %32 = vector.broadcast %cst_21 : f32 to vector<4x128xf32>
    %33 = arith.addf %32, %31 : vector<4x128xf32>
    %34 = arith.divf %32, %33 : vector<4x128xf32>
    %35 = vector.extract_strided_slice %22 {offsets = [0, 256], sizes = [4, 128], strides = [1, 1]} : vector<4x512xf32> to vector<4x128xf32>
    %36 = math.tanh %35 : vector<4x128xf32>
    %37 = vector.extract_strided_slice %22 {offsets = [0, 384], sizes = [4, 128], strides = [1, 1]} : vector<4x512xf32> to vector<4x128xf32>
    %38 = arith.negf %37 : vector<4x128xf32>
    %39 = math.exp %38 : vector<4x128xf32>
    %cst_22 = arith.constant 1.000000e+00 : f32
    %40 = vector.broadcast %cst_22 : f32 to vector<4x128xf32>
    %41 = arith.addf %40, %39 : vector<4x128xf32>
    %42 = arith.divf %40, %41 : vector<4x128xf32>
    %43 = arith.mulf %34, %4 : vector<4x128xf32>
    %44 = arith.mulf %28, %36 : vector<4x128xf32>
    %45 = arith.addf %43, %44 : vector<4x128xf32>
    %46 = math.tanh %45 : vector<4x128xf32>
    %47 = arith.mulf %42, %46 : vector<4x128xf32>
    %c0_23 = arith.constant 0 : index
    %c0_24 = arith.constant 0 : index
    %48 = vector.load %arg10[%c0_23, %c0_24] : memref<4x128xf32, #tpu.memory_space<vmem>>, vector<4x128xf32>
    tpu.vector_store %arg10[%c0_23, %c0_24], %47 {strides = array<i32>} : memref<4x128xf32, #tpu.memory_space<vmem>>, vector<4x128xf32>,
    %c0_25 = arith.constant 0 : index
    %c0_26 = arith.constant 0 : index
    %49 = vector.load %arg11[%c0_25, %c0_26] : memref<4x128xf32, #tpu.memory_space<vmem>>, vector<4x128xf32>
    tpu.vector_store %arg11[%c0_25, %c0_26], %45 {strides = array<i32>} : memref<4x128xf32, #tpu.memory_space<vmem>>, vector<4x128xf32>,
    %50 = arith.truncf %47 : vector<4x128xf32> to vector<4x128xbf16>
    %c0_27 = arith.constant 0 : index
    %c512 = arith.constant 512 : index
    %51 = vector.load %arg5[%c0_27, %c512] : memref<128x640xbf16, #tpu.memory_space<vmem>>, vector<128x128xbf16>
    %cst_28 = arith.constant dense<0.000000e+00> : vector<4x128xf32>
    %52 = tpu.matmul %50, %51, %cst_28 {dimension_numbers = #tpu.dot_dimension_numbers<[1], [0], [0], [1], [0, 0, 1, 1], [], []>} : vector<4x128xbf16>, vector<128x128xbf16>, vector<4x128xf32> -> vector<4x128xf32>
    %c0_29 = arith.constant 0 : index
    %c512_30 = arith.constant 512 : index
    %53 = vector.load %arg8[%c0_29, %c512_30] : memref<1x640xf32, #tpu.memory_space<vmem>>, vector<1x128xf32>
    %54 = vector.broadcast %53 : vector<1x128xf32> to vector<4x128xf32>
    %55 = arith.addf %52, %54 : vector<4x128xf32>
    %56 = tpu.iota {dimensions = array<i32: 1>} : vector<4x128xi32>
    %c40_i32 = arith.constant 40 : i32
    %57 = vector.broadcast %c40_i32 : i32 to vector<4x128xi32>
    %58 = arith.cmpi sge, %56, %57 : vector<4x128xi32>
    %c80_i32 = arith.constant 80 : i32
    %59 = vector.broadcast %c80_i32 : i32 to vector<4x128xi32>
    %60 = arith.cmpi slt, %56, %59 : vector<4x128xi32>
    %61 = arith.andi %58, %60 : vector<4x128xi1>
    %c80_i32_31 = arith.constant 80 : i32
    %62 = vector.broadcast %c80_i32_31 : i32 to vector<4x128xi32>
    %63 = arith.cmpi sge, %56, %62 : vector<4x128xi32>
    %c85_i32 = arith.constant 85 : i32
    %64 = vector.broadcast %c85_i32 : i32 to vector<4x128xi32>
    %65 = arith.cmpi slt, %56, %64 : vector<4x128xi32>
    %66 = arith.andi %63, %65 : vector<4x128xi1>
    %c86_i32 = arith.constant 86 : i32
    %67 = vector.broadcast %c86_i32 : i32 to vector<4x128xi32>
    %68 = arith.cmpi eq, %56, %67 : vector<4x128xi32>
    %cst_32 = arith.constant 0xFF800000 : f32
    %69 = vector.broadcast %cst_32 : f32 to vector<4x128xf32>
    %70 = arith.select %66, %55, %69 : vector<4x128xi1>, vector<4x128xf32>
    %cst_33 = arith.constant dense<0xFF800000> : vector<4xf32>
    %71 = vector.multi_reduction <maximumf>, %70, %cst_33 [1] : vector<4x128xf32> to vector<4xf32>
    %72 = vector.shape_cast %71 : vector<4xf32> to vector<4x1xf32>
    %73 = vector.broadcast %72 : vector<4x1xf32> to vector<4x128xf32>
    %74 = arith.subf %55, %73 : vector<4x128xf32>
    %cst_34 = arith.constant 0xFF800000 : f32
    %75 = vector.broadcast %cst_34 : f32 to vector<4x128xf32>
    %76 = arith.select %66, %74, %75 : vector<4x128xi1>, vector<4x128xf32>
    %77 = math.exp %76 : vector<4x128xf32>
    %cst_35 = arith.constant dense<0.000000e+00> : vector<4xf32>
    %78 = vector.multi_reduction <add>, %77, %cst_35 [1] : vector<4x128xf32> to vector<4xf32>
    %79 = vector.shape_cast %78 : vector<4xf32> to vector<4x1xf32>
    %80 = math.log %79 : vector<4x1xf32>
    %81 = arith.addf %80, %72 : vector<4x1xf32>
    %cst_36 = arith.constant 0.000000e+00 : f32
    %82 = vector.broadcast %cst_36 : f32 to vector<4x128xf32>
    %83 = arith.select %61, %55, %82 : vector<4x128xi1>, vector<4x128xf32>
    %84 = math.exp %83 : vector<4x128xf32>
    %cst_37 = arith.constant 0.000000e+00 : f32
    %85 = vector.broadcast %cst_37 : f32 to vector<4x128xf32>
    %86 = arith.select %68, %55, %85 : vector<4x128xi1>, vector<4x128xf32>
    %87 = arith.negf %86 : vector<4x128xf32>
    %88 = math.exp %87 : vector<4x128xf32>
    %cst_38 = arith.constant 1.000000e+00 : f32
    %89 = vector.broadcast %cst_38 : f32 to vector<4x128xf32>
    %90 = arith.addf %89, %88 : vector<4x128xf32>
    %91 = arith.divf %89, %90 : vector<4x128xf32>
    %92 = arith.select %61, %84, %55 : vector<4x128xi1>, vector<4x128xf32>
    %93 = vector.broadcast %81 : vector<4x1xf32> to vector<4x128xf32>
    %94 = arith.subf %55, %93 : vector<4x128xf32>
    %95 = arith.select %66, %94, %92 : vector<4x128xi1>, vector<4x128xf32>
    %96 = arith.select %68, %91, %95 : vector<4x128xi1>, vector<4x128xf32>
    %c0_39 = arith.constant 0 : index
    %c0_40 = arith.constant 0 : index
    %c0_41 = arith.constant 0 : index
    %97 = vector.load %arg9[%c0_39, %c0_40, %c0_41] : memref<1x4x384xf32, #tpu.memory_space<vmem>>, vector<1x4x128xf32>
    %98 = vector.shape_cast %97 : vector<1x4x128xf32> to vector<4x128xf32>
    %99 = vector.shape_cast %96 : vector<4x128xf32> to vector<1x4x128xf32>
    tpu.vector_store %arg9[%c0_39, %c0_40, %c0_41], %99 {strides = array<i32>} : memref<1x4x384xf32, #tpu.memory_space<vmem>>, vector<1x4x128xf32>,
    %c0_42 = arith.constant 0 : index
    %c0_43 = arith.constant 0 : index
    %c128 = arith.constant 128 : index
    %100 = vector.load %arg9[%c0_42, %c0_43, %c128] : memref<1x4x384xf32, #tpu.memory_space<vmem>>, vector<1x4x128xf32>
    %101 = vector.shape_cast %100 : vector<1x4x128xf32> to vector<4x128xf32>
    %102 = vector.shape_cast %47 : vector<4x128xf32> to vector<1x4x128xf32>
    tpu.vector_store %arg9[%c0_42, %c0_43, %c128], %102 {strides = array<i32>} : memref<1x4x384xf32, #tpu.memory_space<vmem>>, vector<1x4x128xf32>,
    %c0_44 = arith.constant 0 : index
    %c0_45 = arith.constant 0 : index
    %c256 = arith.constant 256 : index
    %103 = vector.load %arg9[%c0_44, %c0_45, %c256] : memref<1x4x384xf32, #tpu.memory_space<vmem>>, vector<1x4x128xf32>
    %104 = vector.shape_cast %103 : vector<1x4x128xf32> to vector<4x128xf32>
    %105 = vector.shape_cast %45 : vector<4x128xf32> to vector<1x4x128xf32>
    tpu.vector_store %arg9[%c0_44, %c0_45, %c256], %105 {strides = array<i32>} : memref<1x4x384xf32, #tpu.memory_space<vmem>>, vector<1x4x128xf32>,
    return
  }
  func.func @transform_0(%arg0: i32) -> (i32, i32, i32) {
    %c0_i32 = arith.constant 0 : i32
    %c0_i32_0 = arith.constant 0 : i32
    %c0_i32_1 = arith.constant 0 : i32
    return %arg0, %c0_i32, %c0_i32_0 : i32, i32, i32
  }
  func.func @transform_1(%arg0: i32) -> (i32, i32, i32) {
    %c0_i32 = arith.constant 0 : i32
    %c0_i32_0 = arith.constant 0 : i32
    %c0_i32_1 = arith.constant 0 : i32
    return %arg0, %c0_i32, %c0_i32_0 : i32, i32, i32
  }
  func.func @transform_2(%arg0: i32) -> (i32, i32) {
    %c0_i32 = arith.constant 0 : i32
    %c0_i32_0 = arith.constant 0 : i32
    %c0_i32_1 = arith.constant 0 : i32
    return %c0_i32, %c0_i32_0 : i32, i32
  }
  func.func @transform_3(%arg0: i32) -> (i32, i32) {
    %c0_i32 = arith.constant 0 : i32
    %c0_i32_0 = arith.constant 0 : i32
    %c0_i32_1 = arith.constant 0 : i32
    return %c0_i32, %c0_i32_0 : i32, i32
  }
  func.func @transform_4(%arg0: i32) -> (i32, i32) {
    %c0_i32 = arith.constant 0 : i32
    %c0_i32_0 = arith.constant 0 : i32
    %c0_i32_1 = arith.constant 0 : i32
    return %c0_i32, %c0_i32_0 : i32, i32
  }
  func.func @transform_5(%arg0: i32) -> (i32, i32) {
    %c0_i32 = arith.constant 0 : i32
    %c0_i32_0 = arith.constant 0 : i32
    %c0_i32_1 = arith.constant 0 : i32
    return %c0_i32, %c0_i32_0 : i32, i32
  }
  func.func @transform_6(%arg0: i32) -> (i32, i32) {
    %c0_i32 = arith.constant 0 : i32
    %c0_i32_0 = arith.constant 0 : i32
    %c0_i32_1 = arith.constant 0 : i32
    return %c0_i32, %c0_i32_0 : i32, i32
  }
  func.func @transform_7(%arg0: i32) -> (i32, i32) {
    %c0_i32 = arith.constant 0 : i32
    %c0_i32_0 = arith.constant 0 : i32
    %c0_i32_1 = arith.constant 0 : i32
    return %c0_i32, %c0_i32_0 : i32, i32
  }
  func.func @transform_8(%arg0: i32) -> (i32, i32, i32) {
    %c0_i32 = arith.constant 0 : i32
    %c0_i32_0 = arith.constant 0 : i32
    %c0_i32_1 = arith.constant 0 : i32
    return %arg0, %c0_i32, %c0_i32_0 : i32, i32, i32
  }
}

</mosaic_0001>

<bundles_post_ra>
// kernel: mdrnn_cell_forward.1
= control target key start
LH: loop header
LB: loop body
LE: loop exit
PB: predicated region body
PF: predicated region fallthrough
CT: control target
= control target key end

     0   :  { %13 = vsyncpa [#allocation5], 0  ;;  %s1214_s0 = inlined_call_operand.vmem [shape: f32[1,4,3], index: 0, kind: input, shape index: {}]   ;;  %s1215_s1 = inlined_call_operand.vmem [shape: f32[1,4,8], index: 1, kind: input, shape index: {}]   ;;  %s1216_s2 = inlined_call_operand.vmem [shape: f32[4,128], index: 2, kind: input, shape index: {}]   ;;  %s1217_s3 = inlined_call_operand.hbm [shape: f32[4,128], index: 3, kind: input, shape index: {}]   ;;  %s1218_s4 = inlined_call_operand.hbm [shape: bf16[128,640], index: 4, kind: input, shape index: {}]   ;;  %s1219_s5 = inlined_call_operand.vmem [shape: bf16[3,512], index: 5, kind: input, shape index: {}]   ;;  %s1220_s6 = inlined_call_operand.hbm [shape: bf16[8,512], index: 6, kind: input, shape index: {}]   ;;  %s1221_s7 = inlined_call_operand.vmem [shape: f32[1,640], index: 7, kind: input, shape index: {}]   ;;  %s1222_s8 = inlined_call_operand.vmem [shape: f32[1,4,384], index: 8, kind: output, shape index: {}]  }
   0x1   :  { %14 = vsyncpa [#allocation7], 0  ;;  %s1053_s27 = smov [#allocation6]   ;;  %s983_s9 = scalar_lea.hbm %s1218_s4, 5120 }
   0x2   :  { %s36_s28 = sshll.u32 %s1053_s27, 4  ;;  %p984_p0 = scmp.ne.s32.totalorder %s1218_s4, %s983_s9  ;;  %s37_s28 = int_to_ptr.vmem [resolvable:$true] %s36_s28 }
   0x3   :  { %p987_p1 = scmp.lt.u32.totalorder %s983_s9, %s1218_s4 }
   0x5   :  { %p989_p2 = pnand %p987_p1, %p984_p0 }
   0x7   :  { %992 = shalt.err (!%p989_p2)
}
   0x8   :  { %s993_s14 = scalar_lea.vmem %s37_s28, 5120  ;;  %p998_p4 = scmp.lt.s32.totalorder %s37_s28, %s37_s28 }
   0x9   :  { %p994_p3 = scmp.ne.s32.totalorder %s37_s28, %s993_s14  ;;  %p999_p5 = scmp.lt.s32.totalorder %s993_s14, %s993_s14 }
   0xb   :  { %p1000_p6 = por %p999_p5, %p998_p4 }
   0xd   :  { %p1001_p7 = pnand %p1000_p6, %p994_p3 }
   0xf   :  { %1004 = shalt.err (!%p1001_p7)
}
  0x10   :  { %s1054_s15 = smov 320   ;;  %s1055_s16 = smov 20  }
  0x11   :  { %42 = dma.hbm_to_vmem [thread:$0]  %s1218_s4, 5120, %s37_s28, [#allocation7], %s1054_s15, %s1054_s15, %s1055_s16  }
  0x12   :  { %s1056_s19 = smov [#allocation4]   ;;  %s1057_s21 = smov [#allocation8]  }
  0x13   :  { %s27_s20 = sshll.u32 %s1056_s19, 4  ;;  %s51_s22 = sshll.u32 %s1057_s21, 4  ;;  %s28_s20 = int_to_ptr.vmem [resolvable:$true] %s27_s20  ;;  %s52_s22 = int_to_ptr.vmem [resolvable:$true] %s51_s22 }
  0x14   :  { %s1005_s25 = scalar_lea.hbm %s1217_s3, 64 }
  0x15   :  { %p1006_p8 = scmp.ne.s32.totalorder %s1217_s3, %s1005_s25  ;;  %p1009_p9 = scmp.lt.u32.totalorder %s1005_s25, %s1217_s3 }
  0x17   :  { %p1011_p10 = pnand %p1009_p9, %p1006_p8 }
  0x19   :  { %1014 = shalt.err (!%p1011_p10)
}
  0x1a   :  { %s1015_s4 = scalar_lea.vmem %s28_s20, 64  ;;  %p1020_p12 = scmp.lt.s32.totalorder %s28_s20, %s28_s20 }
  0x1b   :  { %p1016_p11 = scmp.ne.s32.totalorder %s28_s20, %s1015_s4  ;;  %p1021_p13 = scmp.lt.s32.totalorder %s1015_s4, %s1015_s4 }
  0x1d   :  { %p1022_p0 = por %p1021_p13, %p1020_p12 }
  0x1f   :  { %p1023_p1 = pnand %p1022_p0, %p1016_p11 }
  0x21   :  { %1026 = shalt.err (!%p1023_p1)
}
  0x22   :  { %30 = dma.hbm_to_vmem [thread:$0]  %s1217_s3, 64, %s28_s20, [#allocation5]  }
  0x23   :  { %s1027_s12 = scalar_lea.hbm %s1220_s6, 256 }
  0x24   :  { %p1028_p2 = scmp.ne.s32.totalorder %s1220_s6, %s1027_s12  ;;  %p1031_p3 = scmp.lt.u32.totalorder %s1027_s12, %s1220_s6 }
  0x26   :  { %p1033_p4 = pnand %p1031_p3, %p1028_p2 }
  0x28   :  { %1036 = shalt.err (!%p1033_p4)
}
  0x29   :  { %s1037_s17 = scalar_lea.vmem %s52_s22, 256  ;;  %p1042_p6 = scmp.lt.s32.totalorder %s52_s22, %s52_s22 }
  0x2a   :  { %p1038_p5 = scmp.ne.s32.totalorder %s52_s22, %s1037_s17  ;;  %p1043_p7 = scmp.lt.s32.totalorder %s1037_s17, %s1037_s17 }
  0x2c   :  { %p1044_p8 = por %p1043_p7, %p1042_p6 }
  0x2e   :  { %p1045_p9 = pnand %p1044_p8, %p1038_p5 }
  0x30   :  { %1048 = shalt.err (!%p1045_p9)
}
  0x31   :  { %54 = dma.hbm_to_vmem [thread:$0]  %s1220_s6, 256, %s52_s22, [#allocation7]  }
  0x32   :  { %1049 = dma.done.wait [#allocation5], 64  }
  0x33   :  { %1050 = vsyncadd [#allocation5], 4294967232 }
  0x34   :  { %1051 = dma.done.wait [#allocation7], 5376  }
  0x35   :  { %1052 = vsyncadd [#allocation7], 4294961920  ;;  %v118_v0 = vlaneseq  ;;  %v1058_v1 = vmov 1983009808   ;;  %v1059_v4 = vmov 0   ;;  %vm135_vm0 = vcmask 1040384  }
  0x36   :  { %v116_v2 = vunpack.c.l.s4 %v1058_v1  ;;  %183 = vmatprep.mubr.bf16.mxu1 %v1059_v4  ;;  %425 = vmatprep.mubr.bf16.mxu0 %v1059_v4  ;;  %vm136_vm1 = vcmask 1041408   ;;  %v1060_v7 = vmov 65535   ;;  %v896_v9 = vld [vmem:[#allocation6 + $0x4] ss:$20 sps:$4 sm:$0xff]   ;;  %v898_v10 = vld [vmem:[#allocation6] ss:$20 sps:$4 sm:$0xff]  }
  0x37   :  { %v1145_v3 = vshrl.u32 %v118_v0, 7  ;;  %v137_v8 = vsel %vm135_vm0, 4294967295, %v1060_v7  ;;  %v112_v11 = vld [vmem:[%s1219_s5] sm:$0xff]  ;;  %393 = vmatprep.subr.bf16.mxu0 %v896_v9  ;;  %v900_v15 = vld [vmem:[#allocation6 + $0x2c] ss:$20 sps:$4 sm:$0xff]   ;;  %vm131_vm2 = vcmask 23552  }
  0x38   :  { %v117_v5 = vunpack.c.0.s8 %v116_v2  ;;  %v114_v12 = vcombine.high %v112_v11, %v112_v11  ;;  %v138_v14 = vsel %vm136_vm1, %v137_v8, 0  ;;  %394 = vmatpush1.bf16.msra.mxu0 %v898_v10  ;;  %v902_v16 = vld [vmem:[#allocation6 + $0x28] ss:$20 sps:$4 sm:$0xff]   ;;  %v110_v21 = vld [vmem:[%s1214_s0] sm:$0xf]  ;;  %v477_v56 = vld [vmem:[#allocation8] sm:$0xff] }
  0x39   :  { %395 = vmatprep.subr.bf16.mxu0 %v900_v15  ;;  %v903_v19 = vld [vmem:[#allocation6 + $0x54] ss:$20 sps:$4 sm:$0xff]   ;;  %v905_v24 = vld [vmem:[#allocation6 + $0x50] ss:$20 sps:$4 sm:$0xff]   ;;  %v111_v25 = vpack.c.bf16 %v110_v21, %v110_v21  ;;  %v911_v29 = vld [vmem:[#allocation6 + $0xc] ss:$20 sps:$4 sm:$0xff]   ;;  %v837_v58 = vcombine.high %v477_v56, %v477_v56  ;;  %v836_v59 = vcombine.low %v477_v56, %v477_v56 }
  0x3a   :  { %v120_v6 = vsub.s32 %v117_v5, %v1145_v3  ;;  %v906_v27 = vld [vmem:[#allocation6 + $0x7c] ss:$20 sps:$4 sm:$0xff]   ;;  %v908_v30 = vld [vmem:[#allocation6 + $0x78] ss:$20 sps:$4 sm:$0xff]   ;;  %v914_v32 = vld [vmem:[#allocation6 + $0xa0] ss:$20 sps:$4 sm:$0xff]  }
  0x3b   :  { %v912_v31 = vld [vmem:[#allocation6 + $0xa4] ss:$20 sps:$4 sm:$0xff]   ;;  %v918_v33 = vld [vmem:[#allocation6 + $0xcc] ss:$20 sps:$4 sm:$0xff]   ;;  %v909_v34 = vld [vmem:[#allocation6 + $0x8] ss:$20 sps:$4 sm:$0xff]  }
  0x3c   :  { %v121_v13 = vrot.slane %v112_v11, %v120_v6  ;;  %v128_v18 = vrot.slane %v114_v12, %v120_v6  ;;  %396 = vmatpush1.bf16.msra.mxu0 %v902_v16  ;;  %v917_v35 = vld [vmem:[#allocation6 + $0x34] ss:$20 sps:$4 sm:$0xff]   ;;  %v915_v39 = vld [vmem:[#allocation6 + $0x30] ss:$20 sps:$4 sm:$0xff]   ;;  %v921_v42 = vld [vmem:[#allocation6 + $0x58] ss:$20 sps:$4 sm:$0xff]  }
  0x3d   :  { %397 = vmatprep.subr.bf16.mxu0 %v903_v19  ;;  %v71_v36 = vld [vmem:[%s1216_s2] sm:$0xf]  ;;  %v920_v37 = vld [vmem:[#allocation6 + $0xc8] ss:$20 sps:$4 sm:$0xff]   ;;  %v926_v41 = vld [vmem:[#allocation6 + $0xf0] ss:$20 sps:$4 sm:$0xff]  }
  0x3e   :  { %v129_v17 = vcombine.high %v121_v13, %v121_v13  ;;  %v140_v20 = vand.u32 %v138_v14, %v121_v13  ;;  %v130_v23 = vcombine.high %v128_v18, %v128_v18  ;;  %v146_v28 = vand.u32 %v138_v14, %v128_v18  ;;  %72 = vst [vmem:[#allocation2] sm:$0xf] %v71_v36  ;;  %v924_v38 = vld [vmem:[#allocation6 + $0xf4] ss:$20 sps:$4 sm:$0xff]   ;;  %v923_v40 = vld [vmem:[#allocation6 + $0x5c] ss:$20 sps:$4 sm:$0xff]  }
  0x3f   :  { %v930_v43 = vld [vmem:[#allocation6 + $0x11c] ss:$20 sps:$4 sm:$0xff]   ;;  %v929_v44 = vld [vmem:[#allocation6 + $0x84] ss:$20 sps:$4 sm:$0xff]   ;;  %v927_v47 = vld [vmem:[#allocation6 + $0x80] ss:$20 sps:$4 sm:$0xff]  }
  0x40   :  { %v143_v22 = vand.u32 %v138_v14, %v129_v17  ;;  %v149_v26 = vand.u32 %v138_v14, %v130_v23  ;;  %398 = vmatpush1.bf16.msra.mxu0 %v905_v24  ;;  %v932_v45 = vld [vmem:[#allocation6 + $0x118] ss:$20 sps:$4 sm:$0xff]   ;;  %v933_v50 = vld [vmem:[#allocation6 + $0xa8] ss:$20 sps:$4 sm:$0xff]   ;;  %v936_v52 = vld [vmem:[#allocation6 + $0xd0] ss:$20 sps:$4 sm:$0xff]  }
  0x41   :  { %399 = vmatprep.subr.bf16.mxu0 %v906_v27  ;;  %v935_v48 = vld [vmem:[#allocation6 + $0xac] ss:$20 sps:$4 sm:$0xff]   ;;  %v938_v51 = vld [vmem:[#allocation6 + $0xd4] ss:$20 sps:$4 sm:$0xff]   ;;  %v941_v53 = vld [vmem:[#allocation6 + $0xfc] ss:$20 sps:$4 sm:$0xff]  }
  0x42   :  { %151 = vmatprep.subr.bf16.mxu1 %v143_v22  ;;  %v939_v54 = vld [vmem:[#allocation6 + $0xf8] ss:$20 sps:$4 sm:$0xff]   ;;  %v942_v57 = vld [vmem:[#allocation6 + $0x120] ss:$20 sps:$4 sm:$0xff]   ;;  %vm493_vm3 = vcmask 1043456   ;;  %vm489_vm4 = vcmask 64512  }
  0x43   :  { %152 = vmatpush1.bf16.msra.mxu1 %v140_v20  ;;  %v944_v55 = vld [vmem:[#allocation6 + $0x124] ss:$20 sps:$4 sm:$0xff]   ;;  %v478_v60 = vld [vmem:[#allocation8 + $0x8] sm:$0xff]  ;;  %v495_v61 = vsel %vm493_vm3, %v836_v59, 0  ;;  %v475_v63 = vld [vmem:[%s1215_s1] sm:$0xf] }
  0x44   :  { %192 = vmatprep.subr.bf16.mxu1 %v149_v26  ;;  %400 = vmatpush1.bf16.msra.mxu0 %v908_v30  ;;  %v839_v62 = vcombine.high %v478_v60, %v478_v60  ;;  %v838_v1 = vcombine.low %v478_v60, %v478_v60  ;;  %v476_v2 = vpack.c.bf16 %v475_v63, %v475_v63  ;;  %v949_v6 = vld [vmem:[#allocation6 + $0x10] ss:$20 sps:$4 sm:$0xff]   ;;  %v1061_v7 = vmov 0.0   ;;  %v73_v8 = vld [vmem:[#allocation4] sm:$0xf] }
  0x45   :  { %401 = vmatprep.subr.bf16.mxu0 %v912_v31  ;;  %v75_v46 = vld [vmem:[#allocation2] sm:$0xf]  ;;  %74 = vst [vmem:[#allocation3] sm:$0xf] %v73_v8  ;;  %v950_v9 = vld [vmem:[#allocation6 + $0x38] ss:$20 sps:$4 sm:$0xff]  }
  0x46   :  { %802 = vmatmul.mubr.msk.bf16.vlgmr.msra.gmra.mrb[0].mxu1 %vm131_vm2, %v111_v25  ;;  %v77_v49 = vpack.c.bf16 %v75_v46, %v75_v46  ;;  %v501_v5 = vsel %vm493_vm3, %v838_v1, 0  ;;  %v951_v10 = vld [vmem:[#allocation6 + $0x60] ss:$20 sps:$4 sm:$0xff]   ;;  %v952_v11 = vld [vmem:[#allocation6 + $0x88] ss:$20 sps:$4 sm:$0xff]   ;;  %vm1062_vm5 = vmmov 0  }
  0x47   :  { %193 = vmatpush1.bf16.msra.mxu1 %v146_v28  ;;  %224 = vmatprep.mubr.bf16.mxu1 %v1059_v4  ;;  %v953_v12 = vld [vmem:[#allocation6 + $0xb0] ss:$20 sps:$4 sm:$0xff]   ;;  %v955_v13 = vld [vmem:[#allocation6 + $0x100] ss:$20 sps:$4 sm:$0xff]   ;;  %v956_v14 = vld [vmem:[#allocation6 + $0x128] ss:$20 sps:$4 sm:$0xff]  }
  0x48   :  { %434 = vmatprep.subr.bf16.mxu1 %v911_v29  ;;  %402 = vmatpush1.bf16.msra.mxu0 %v914_v32  ;;  %v592_v36 = vld [vmem:[%s1221_s7] sm:$0xf] }
  0x49   :  { %403 = vmatprep.subr.bf16.mxu0 %v918_v33 }
  0x4c   :  { %404 = vmatpush1.bf16.msra.mxu0 %v920_v37  ;;  %v600_v37 = vsub.s32 1, %v1145_v3 }
  0x4d   :  { %405 = vmatprep.subr.bf16.mxu0 %v924_v38 }
  0x4e   :  { %803 = vmatmul.mubr.msk.bf16.vlgmr.msra.gmra.mrb[4].mxu1 %vm131_vm2, %v111_v25 }
  0x4f   :  { %435 = vmatpush1.bf16.msra.mxu1 %v909_v34  ;;  %466 = vmatprep.mubr.bf16.mxu1 %v1059_v4 }
  0x50   :  { %436 = vmatprep.subr.bf16.mxu1 %v917_v35  ;;  %406 = vmatpush1.bf16.msra.mxu0 %v926_v41  ;;  %v596_v35 = vsub.s32 0, %v1145_v3 }
  0x51   :  { %407 = vmatprep.subr.bf16.mxu0 %v930_v43 }
  0x52   :  { %v597_v38 = vrot.slane %v592_v36, %v596_v35 }
  0x53   :  { %437 = vmatpush1.bf16.msra.mxu1 %v915_v39 }
  0x54   :  { %438 = vmatprep.subr.bf16.mxu1 %v923_v40  ;;  %408 = vmatpush1.bf16.msra.mxu0 %v932_v45  ;;  %v601_v40 = vrot.slane %v592_v36, %v600_v37 }
  0x55   :  { %866 = vmatprep.subr.bf16.mxu0 %v1061_v7 }
  0x57   :  { %439 = vmatpush1.bf16.msra.mxu1 %v921_v42  ;;  %426 = vmatmul.mubr.bf16.vlgmr.msra.gmra.mrb[0].mxu0 %v77_v49 }
  0x58   :  { %440 = vmatprep.subr.bf16.mxu1 %v929_v44  ;;  %867 = vmatpush3.bf16.msra.mxu0 %v949_v6 }
  0x59   :  { %868 = vmatprep.subr.bf16.mxu0 %v1061_v7  ;;  %882 = vmatprep.mubr.msk.bf16.mxu0 %vm1062_vm5, %v1061_v7 }
  0x5b   :  { %441 = vmatpush1.bf16.msra.mxu1 %v927_v47 }
  0x5c   :  { %442 = vmatprep.subr.bf16.mxu1 %v935_v48  ;;  %869 = vmatpush3.bf16.msra.mxu0 %v950_v9  ;;  %v608_v48 = vsub.s32 3, %v1145_v3 }
  0x5d   :  { %870 = vmatprep.subr.bf16.mxu0 %v1061_v7 }
  0x5f   :  { %443 = vmatpush1.bf16.msra.mxu1 %v933_v50 }
  0x60   :  { %444 = vmatprep.subr.bf16.mxu1 %v938_v51  ;;  %871 = vmatpush3.bf16.msra.mxu0 %v951_v10  ;;  %v604_v51 = vsub.s32 2, %v1145_v3 }
  0x61   :  { %872 = vmatprep.subr.bf16.mxu0 %v1061_v7 }
  0x63   :  { %445 = vmatpush1.bf16.msra.mxu1 %v936_v52 }
  0x64   :  { %446 = vmatprep.subr.bf16.mxu1 %v941_v53  ;;  %873 = vmatpush3.bf16.msra.mxu0 %v952_v11  ;;  %v609_v53 = vrot.slane %v592_v36, %v608_v48 }
  0x65   :  { %874 = vmatprep.subr.bf16.mxu0 %v1061_v7 }
  0x67   :  { %447 = vmatpush1.bf16.msra.mxu1 %v939_v54 }
  0x68   :  { %448 = vmatprep.subr.bf16.mxu1 %v944_v55  ;;  %875 = vmatpush3.bf16.msra.mxu0 %v953_v12 }
  0x69   :  { %876 = vmatprep.subr.bf16.mxu0 %v1061_v7 }
  0x6b   :  { %449 = vmatpush1.bf16.msra.mxu1 %v942_v57 }
  0x6c   :  { %840 = vmatprep.subr.msk.bf16.mxu1 %vm493_vm3, %v837_v58  ;;  %v605_v58 = vrot.slane %v592_v36, %v604_v51 }
  0x6e   :  { %467 = vmatmul.mubr.bf16.vlgmr.msra.gmra.mrb[8].mxu1 %v77_v49 }
  0x6f   :  { %507 = vmatpush1.bf16.msra.mxu1 %v495_v61  ;;  %538 = vmatprep.mubr.bf16.mxu1 %v1059_v4 }
  0x70   :  { %842 = vmatprep.subr.msk.bf16.mxu1 %vm493_vm3, %v839_v62 }
  0x76   :  { %841 = vmatmul.mubr.msk.bf16.vlgmr.msra.gmra.mrb[12].mxu1 %vm489_vm4, %v476_v2 }
  0x77   :  { %548 = vmatpush1.bf16.msra.mxu1 %v501_v5  ;;  %579 = vmatprep.mubr.bf16.mxu1 %v1059_v4  ;;  %v954_v4 = vld [vmem:[#allocation6 + $0xd8] ss:$20 sps:$4 sm:$0xff]  }
  0x78   :  { %877 = vmatpush3.bf16.msra.mxu0 %v954_v4 }
  0x79   :  { %878 = vmatprep.subr.bf16.mxu0 %v1061_v7 }
  0x7c   :  { %879 = vmatpush3.bf16.msra.mxu0 %v955_v13 }
  0x7d   :  { %880 = vmatprep.subr.bf16.mxu0 %v1061_v7  ;;  %v76_v7 = vld [vmem:[#allocation3] sm:$0xf] }
  0x7e   :  { %843 = vmatmul.mubr.msk.bf16.vlgmr.msra.gmra.mrb[16].mxu1 %vm489_vm4, %v476_v2 }
  0x80   :  { %881 = vmatpush3.bf16.msra.mxu0 %v956_v14 }
 0x119   :  { %v185_v15 = vpop.f32.mrb[0].mxu1 }
 0x11a   :  { %v187_v16 = vpop.f32.mrb[1].mxu1 }
 0x11b   :  { %v189_v17 = vpop.f32.mrb[2].mxu1 }
 0x11c   :  { %v190_v18 = vpop.f32.mrb[3].mxu1  ;;  %v757_v17 = vand.u32 127, %v118_v0 }
 0x11d   :  { %v847_v18 = vld [vmem:[%s1221_s7 + $0x4] ss:$0 sm:$0xff] }
 0x11e   :  { %vm761_vm6 = vcmp.ge.s32.totalorder %v757_v17, 80  ;;  %vm762_vm7 = vcmp.lt.s32.totalorder %v757_v17, 85  ;;  %vm764_vm9 = vcmp.eq.s32.totalorder %v757_v17, 86  ;;  %vm758_vm10 = vcmp.ge.s32.totalorder %v757_v17, 40 }
 0x11f   :  { %vm1189_vm8 = vmand %vm761_vm6, %vm762_vm7  ;;  %vm759_vm11 = vcmp.lt.s32.totalorder %v757_v17, 80 }
 0x120   :  { %vm1200_vm12 = vmand %vm758_vm10, %vm759_vm11 }
 0x121   :  { %v226_v19 = vpop.f32.mrb[4].mxu1 }
 0x122   :  { %v228_v20 = vpop.f32.mrb[5].mxu1 }
 0x123   :  { %v230_v21 = vpop.f32.mrb[6].mxu1 }
 0x124   :  { %v231_v22 = vpop.f32.mrb[7].mxu1 }
 0x12a   :  { %v427_v23 = vpop.f32.mrb[0].mxu0 }
 0x12b   :  { %v428_v24 = vadd.f32 %v427_v23, %v185_v15  ;;  %v429_v25 = vpop.f32.mrb[1].mxu0 }
 0x12c   :  { %v430_v26 = vadd.f32 %v429_v25, %v187_v16  ;;  %v431_v27 = vpop.f32.mrb[2].mxu0 }
 0x12d   :  { %v432_v28 = vpop.f32.mrb[3].mxu0 }
 0x141   :  { %v468_v29 = vpop.f32.mrb[8].mxu1 }
 0x142   :  { %v469_v30 = vadd.f32 %v468_v29, %v226_v19  ;;  %v470_v31 = vpop.f32.mrb[9].mxu1 }
 0x143   :  { %v471_v32 = vadd.f32 %v470_v31, %v228_v20  ;;  %v472_v33 = vpop.f32.mrb[10].mxu1 }
 0x144   :  { %v473_v34 = vpop.f32.mrb[11].mxu1 }
 0x149   :  { %v540_v39 = vpop.f32.mrb[12].mxu1 }
 0x14a   :  { %v588_v41 = vadd.f32 %v540_v39, %v428_v24  ;;  %v542_v42 = vpop.f32.mrb[13].mxu1 }
 0x14b   :  { %v589_v43 = vadd.f32 %v542_v42, %v430_v26  ;;  %v544_v44 = vpop.f32.mrb[14].mxu1 }
 0x14c   :  { %v614_v45 = vadd.f32 %v597_v38, %v588_v41  ;;  %v545_v46 = vpop.f32.mrb[15].mxu1 }
 0x14d   :  { %v615_v47 = vadd.f32 %v601_v40, %v589_v43 }
 0x14e   :  { %v844_v49 = vmul.f32 -1.442695, %v614_v45 }
 0x14f   :  { %v845_v50 = vmul.f32 -1.442695, %v615_v47 }
 0x150   :  { %957 = vpow2.f32 %v844_v49 }
 0x151   :  { %959 = vpow2.f32 %v845_v50  ;;  %v581_v52 = vpop.f32.mrb[16].mxu1 }
 0x152   :  { %v590_v54 = vadd.f32 %v581_v52, %v469_v30  ;;  %v583_v55 = vpop.f32.mrb[17].mxu1 }
 0x153   :  { %v591_v56 = vadd.f32 %v583_v55, %v471_v32  ;;  %v585_v57 = vpop.f32.mrb[18].mxu1 }
 0x154   :  { %v586_v59 = vpop.f32.mrb[19].mxu1  ;;  %v616_v62 = vadd.f32 %v605_v58, %v590_v54 }
 0x155   :  { %v617_v60 = vadd.f32 %v609_v53, %v591_v56 }
 0x157   :  { %v846_v61 = vmul.f32 -1.442695, %v617_v60 }
 0x159   :  { %961 = vpow2.f32 %v846_v61 }
 0x15a   :  { %v958_v63 = vpop.eup %957  ;;  %963 = vtanh.f32 %v616_v62 }
 0x15b   :  { %v960_v1 = vpop.eup %959  ;;  %v621_v2 = vadd.f32 1.0, %v958_v63 }
 0x15c   :  { %v627_v5 = vadd.f32 1.0, %v960_v1 }
 0x15d   :  { %965 = vrcp.f32 %v621_v2 }
 0x15e   :  { %967 = vrcp.f32 %v627_v5 }
 0x163   :  { %v962_v3 = vpop.eup %961 }
 0x164   :  { %v964_v6 = vpop.eup %963  ;;  %v634_v11 = vadd.f32 1.0, %v962_v3 }
 0x166   :  { %969 = vrcp.f32 %v634_v11 }
 0x167   :  { %v966_v8 = vpop.eup %965 }
 0x168   :  { %v968_v9 = vpop.eup %967  ;;  %v638_v10 = vmul.f32 %v966_v8, %v964_v6 }
 0x169   :  { %v637_v12 = vmul.f32 %v968_v9, %v76_v7 }
 0x16b   :  { %v639_v4 = vadd.f32 %v638_v10, %v637_v12 }
 0x16d   :  { %971 = vtanh.f32 %v639_v4  ;;  %643 = vst [vmem:[#allocation3] sm:$0xf] %v639_v4  ;;  %795 = vst [vmem:[%s1222_s8 + $0x8] sm:$0xf] %v639_v4 }
 0x170   :  { %v970_v13 = vpop.eup %969 }
 0x177   :  { %v972_v14 = vpop.eup %971 }
 0x178   :  { %v641_v15 = vmul.f32 %v972_v14, %v970_v13 }
 0x17a   :  { %642 = vst [vmem:[#allocation2] sm:$0xf] %v641_v15  ;;  %v644_v16 = vpack.c.bf16 %v641_v15, %v641_v15  ;;  %794 = vst [vmem:[%s1222_s8 + $0x4] sm:$0xf] %v641_v15 }
 0x17c   :  { %883 = vmatmul.mubr.bf16.vlgmr.msra.gmra.mrb[4].mxu0 %v644_v16 }
 0x24f   :  { %v750_v19 = vpop.f32.mrb[4].mxu0 }
 0x250   :  { %v751_v21 = vadd.f32 %v847_v18, %v750_v19  ;;  %v884_v22 = vpop.f32.mrb[5].mxu0 }
 0x251   :  { %v753_v23 = vpop.f32.mrb[6].mxu0 }
 0x252   :  { %v885_v24 = vpop.f32.mrb[7].mxu0  ;;  %v765_v25 = vsel %vm1189_vm8, %v751_v21, -inf  ;;  %v782_v32 = vsel %vm764_vm9, %v751_v21, 0.0  ;;  %v779_v35 = vsel %vm1200_vm12, %v751_v21, 0.0 }
 0x253   :  { %v766_v0 = vsel %vm493_vm3, %v765_v25, -inf  ;;  %v856_v33 = vmul.f32 -1.442695, %v782_v32  ;;  %v780_v36 = vmul.f32 1.442695, %v779_v35 }
 0x254   :  { %767 = vmax.xlane.f32.xlu0 %v766_v0 }
 0x2e1   :  { %v768_v26 = vpop.xlane.xlu0 %767 }
 0x2e2   :  { %v769_v27 = vsub.f32 %v751_v21, %v768_v26 }
 0x2e4   :  { %v770_v28 = vsel %vm1189_vm8, %v769_v27, -inf }
 0x2e5   :  { %v771_v29 = vmul.f32 1.442695, %v770_v28 }
 0x2e7   :  { %973 = vpow2.f32 %v771_v29 }
 0x2e8   :  { %975 = vpow2.f32 %v856_v33 }
 0x2f1   :  { %v974_v30 = vpop.eup %973 }
 0x2f2   :  { %v773_v31 = vsel %vm493_vm3, %v974_v30, 0.0  ;;  %v976_v38 = vpop.eup %975 }
 0x2f3   :  { %774 = vadd.xlane.f32.xlu0 %v773_v31  ;;  %v786_v39 = vadd.f32 1.0, %v976_v38 }
 0x380   :  { %v775_v37 = vpop.xlane.xlu0 %774 }
 0x381   :  { %977 = vlog2.f32 %v775_v37 }
 0x382   :  { %979 = vpow2.f32 %v780_v36 }
 0x383   :  { %981 = vrcp.f32 %v786_v39 }
 0x38b   :  { %v978_v40 = vpop.eup %977 }
 0x38c   :  { %v777_v41 = vmul.f32 0.6931472, %v978_v40  ;;  %v980_v42 = vpop.eup %979 }
 0x38d   :  { %v789_v45 = vsel %vm1200_vm12, %v980_v42, %v751_v21  ;;  %v982_v46 = vpop.eup %981 }
 0x38e   :  { %v778_v43 = vadd.f32 %v777_v41, %v768_v26 }
 0x390   :  { %v790_v44 = vsub.f32 %v751_v21, %v778_v43 }
 0x392   :  { %v791_v47 = vsel %vm1189_vm8, %v790_v44, %v789_v45 }
 0x393   :  { %v792_v48 = vsel %vm764_vm9, %v982_v46, %v791_v47 }
 0x394   :  { %793 = vst [vmem:[%s1222_s8] sm:$0xf] %v792_v48 }
 0x395   :  { %800 = vsyncpa [#allocation5], 1 }
 0x396   :  { %801 = vsyncpa [#allocation7], 1 }

</bundles_post_ra>
